<compile_context>
chip_gen: v7x
topology: tpu7x:2x2x1
jax: 0.10.0
libtpu: 0.0.40
codegen_flags: <defaults>
</compile_context>

<pallas_src>
import functools

import jax
import jax.numpy as jnp
from jax.experimental import pallas as pl
from jax.experimental.pallas import tpu as pltpu

N_STEPS = 4          # mirrors SamplerStep(n_steps=4); static, like __init__
_MiB = 1 << 20


# --------------------------------------------------------------------------- #
# Kernels
# --------------------------------------------------------------------------- #
def _resident_m_kernel(x_ref, m_ref, o_ref, *, n_inner):
    """Applies x <- x @ M  n_inner times; M is VMEM-resident (single buffer)."""
    m = m_ref[...]
    if n_inner == 1:
        # Fused path: one MXU matmul, one cast, no f32 carry round-trip.
        o_ref[...] = jnp.dot(
            x_ref[...].astype(m.dtype), m,
            preferred_element_type=jnp.float32).astype(o_ref.dtype)
    else:
        # Serial in-kernel loop: f32 carry (v5e has no bf16 VPU), fully
        # unrolled so the LLO scheduler sees every matmul.
        def body(_, x):
            return jnp.dot(x.astype(m.dtype), m,
                           preferred_element_type=jnp.float32)

        x_final = jax.lax.fori_loop(0, n_inner, body,
                                    x_ref[...].astype(jnp.float32),
                                    unroll=True)
        o_ref[...] = x_final.astype(o_ref.dtype)


def _stream_k_kernel(x_ref, m_ref, o_ref, acc_ref):
    """One step  x @ M  with M streamed in (tk, D) slabs along a K grid axis."""
    k = pl.program_id(1)

    @pl.when(k == 0)
    def _():
        acc_ref[...] = jnp.zeros_like(acc_ref)

    acc_ref[...] += jnp.dot(x_ref[...].astype(m_ref.dtype), m_ref[...],
                            preferred_element_type=jnp.float32)

    @pl.when(k == pl.num_programs(1) - 1)
    def _():
        o_ref[...] = acc_ref[...].astype(o_ref.dtype)


# --------------------------------------------------------------------------- #
# Wrapper helpers
# --------------------------------------------------------------------------- #
def _round_up(v, m):
    return ((v + m - 1) // m) * m


def _pick_tile_b(B):
    # Large tiles amortize the ~0.35 us/grid-step overhead, but keep >= 4 grid
    # steps when B allows so both v7x TensorCores get >= 2 steps each.
    for tb in (1024, 512, 256, 128):
        if pl.cdiv(B, tb) >= 4:
            return tb
    return max(8, min(128, _round_up(B, 8)))


def _pick_tile_k(d_pad):
    for tk in (1024, 512, 256, 128):
        if d_pad % tk == 0:
            return tk
    return d_pad


def _vmem_budget_bytes():
    # Device-aware scoped-VMEM budget: ~100 MiB on the 128 MiB generations
    # (v5e/v6e), ~52 MiB on v7x (64 MiB per TensorCore).
    try:
        cap = int(pltpu.get_tpu_info().vmem_capacity_bytes)
    except Exception:  # info unavailable: fall back to the smallest generation
        cap = 64 * _MiB
    return min(100 * _MiB, cap - 12 * _MiB)


# --------------------------------------------------------------------------- #
# Forward (SamplerStep.forward equivalent)
# --------------------------------------------------------------------------- #
def sampler_step_forward(x, a, eps, *, n_steps=N_STEPS, tile_b=None,
                         tile_k=None, fuse_steps=True, force_stream_k=False,
                         compute_dtype=jnp.bfloat16, out_dtype=None):
    """Applies the concrete _step (x <- x @ (I - eps*A)) n_steps times.

    x may be f32 or bf16; pass out_dtype=jnp.bfloat16 to halve output HBM
    traffic when the caller's precision budget allows (no wrapper-side astype
    is ever inserted).
    """
    B, D = x.shape
    out_dtype = x.dtype if out_dtype is None else out_dtype
    eps = jnp.asarray(eps, jnp.float32).reshape(())

    # Step operator with eps folded in (computed once, reused by every tile).
    m = jnp.eye(D, dtype=jnp.float32) - eps * a.astype(jnp.float32)
    if fuse_steps:
        # M^n in f32 by repeated squaring, cast ONCE to bf16 -> a single matmul
        # per batch tile.  (Slightly different rounding than n separate bf16
        # steps; well within sampler accuracy.)
        m = jnp.linalg.matrix_power(m, n_steps)
        n_inner = 1
    else:
        n_inner = n_steps
    m = m.astype(compute_dtype)

    # Lane alignment: the common case D % 128 == 0 needs NO pad/slice HBM
    # passes.  Ragged D (rare path) pads the feature axis once.
    d_pad = _round_up(D, 128)
    if d_pad != D:
        x = jnp.pad(x, ((0, 0), (0, d_pad - D)))
        m = jnp.pad(m, ((0, d_pad - D), (0, d_pad - D)))

    tb = _pick_tile_b(B) if tile_b is None else max(8, _round_up(tile_b, 8))
    grid_b = pl.cdiv(B, tb)   # ragged B: Pallas masks the partial last block

    isz = lambda dt: jnp.dtype(dt).itemsize
    budget = _vmem_budget_bytes()
    io_bytes = (B * D * (isz(x.dtype) + isz(out_dtype))
                + d_pad * d_pad * isz(compute_dtype))

    # Resident-M footprint: single-buffered M + double-buffered x/out tiles
    # + one f32 compute temp (carry / pre-cast dot result).  No double-counted
    # "carry buffers".
    resident_fp = (d_pad * d_pad * isz(compute_dtype)
                   + 2 * tb * d_pad * isz(x.dtype)
                   + 2 * tb * d_pad * isz(out_dtype)
                   + tb * d_pad * 4)
    use_stream_k = force_stream_k or resident_fp > budget

    if not use_stream_k:
        vmem_limit = int(min(max(resident_fp + 4 * _MiB, 32 * _MiB),
                             budget + 12 * _MiB))
        out = pl.pallas_call(
            functools.partial(_resident_m_kernel, n_inner=n_inner),
            out_shape=jax.ShapeDtypeStruct((B, d_pad), out_dtype),
            grid_spec=pltpu.PrefetchScalarGridSpec(
                num_scalar_prefetch=0,
                grid=(grid_b,),
                in_specs=[
                    pl.BlockSpec((tb, d_pad), lambda i: (i, 0)),   # x streams
                    pl.BlockSpec((d_pad, d_pad), lambda i: (0, 0),
                                 pipeline_mode=pl.Buffered(1)),    # M resident
                ],
                out_specs=pl.BlockSpec((tb, d_pad), lambda i: (i, 0)),
            ),
            compiler_params=pltpu.CompilerParams(
                dimension_semantics=("parallel",),   # v7x: 2 TCs split batch
                vmem_limit_bytes=vmem_limit,
            ),
            cost_estimate=pl.CostEstimate(flops=2 * B * D * D * n_inner,
                                          transcendentals=0,
                                          bytes_accessed=io_bytes),
        )(x, m)
        return out if d_pad == D else out[:, :D]

    # ----- K-streamed path: resident M does not fit (or explicitly forced) ---
    tk = _pick_tile_k(d_pad) if tile_k is None else tile_k
    assert d_pad % tk == 0, "tile_k must divide the (128-aligned) feature dim"
    grid_k = d_pad // tk
    buf_isz = max(isz(x.dtype), isz(out_dtype))
    stream_fp = (2 * tk * d_pad * isz(compute_dtype)   # M slabs, double-buffered
                 + 2 * tb * tk * isz(x.dtype)          # x blocks
                 + 2 * tb * d_pad * buf_isz            # out tiles
                 + tb * d_pad * 4)                     # f32 accumulator scratch
    if stream_fp > budget:
        raise ValueError(
            f"sampler_step_forward: no tiling fits VMEM "
            f"(need {stream_fp} B, budget {budget} B); lower tile_b/tile_k.")
    vmem_limit = int(min(max(stream_fp + 4 * _MiB, 32 * _MiB),
                         budget + 12 * _MiB))

    def one_step(xi, odt):
        return pl.pallas_call(
            _stream_k_kernel,
            out_shape=jax.ShapeDtypeStruct((B, d_pad), odt),
            grid_spec=pltpu.PrefetchScalarGridSpec(
                num_scalar_prefetch=0,
                grid=(grid_b, grid_k),
                in_specs=[
                    pl.BlockSpec((tb, tk), lambda i, k: (i, k)),
                    pl.BlockSpec((tk, d_pad), lambda i, k: (k, 0)),
                ],
                out_specs=pl.BlockSpec((tb, d_pad), lambda i, k: (i, 0)),
                scratch_shapes=[pltpu.VMEM((tb, d_pad), jnp.float32)],
            ),
            compiler_params=pltpu.CompilerParams(
                dimension_semantics=("parallel", "arbitrary"),
                vmem_limit_bytes=vmem_limit,
            ),
            cost_estimate=pl.CostEstimate(flops=2 * B * D * D,
                                          transcendentals=0,
                                          bytes_accessed=io_bytes),
        )(xi, m)

    # TODO(synk): the unfused streamed fallback round-trips HBM once per step;
    #             prefer fuse_steps=True when M does not fit VMEM.
    xcur = x
    for s in range(n_inner):
        xcur = one_step(xcur, out_dtype if s == n_inner - 1 else xcur.dtype)
    return xcur if d_pad == D else xcur[:, :D]


# --------------------------------------------------------------------------- #
# Reference (plain-JAX mirror of SamplerStep.forward with the concrete _step)
# --------------------------------------------------------------------------- #
def _reference_forward(x, a, eps, n_steps=N_STEPS):
    x = x.astype(jnp.float32)
    a = a.astype(jnp.float32)
    for _ in range(n_steps):
        x = x - eps * (x @ a)
    return x


if __name__ == "__main__":
    key = jax.random.PRNGKey(0)
    kx, ka = jax.random.split(key)

    # Lane-aligned shapes (D % 128 == 0) -> zero pad/slice HBM passes.
    B, D = 512, 256
    x = jax.random.normal(kx, (B, D), dtype=jnp.float32)

    # Deterministic symmetric PSD "preconditioner" matrix.
    r = jax.random.normal(ka, (D, D), dtype=jnp.float32)
    a = (r @ r.T) / D + 0.1 * jnp.eye(D, dtype=jnp.float32)
    eps = 0.05

    ref = _reference_forward(x, a, eps)
    tol = dict(atol=3e-2, rtol=3e-2)   # bf16 operands, f32 accumulation

    # Fused: one bf16 matmul per batch tile against the precomputed M^n.
    out_fused = jax.block_until_ready(sampler_step_forward(x, a, eps,
                                                           fuse_steps=True))
    assert jnp.allclose(out_fused, ref, **tol), "fused mismatch vs reference"

    # Unfused: n_steps unrolled, serially dependent matmuls in-kernel.
    out_loop = jax.block_until_ready(sampler_step_forward(x, a, eps,
                                                          fuse_steps=False))
    assert jnp.allclose(out_loop, ref, **tol), "loop mismatch vs reference"

    # Ragged batch: grid = cdiv(B, tb), Pallas masks the partial last block
    # (no padded HBM copies).
    xr = x[:300]
    out_ragged = jax.block_until_ready(sampler_step_forward(xr, a, eps,
                                                            fuse_steps=True))
    assert jnp.allclose(out_ragged, _reference_forward(xr, a, eps), **tol), \
        "ragged-batch mismatch vs reference"

    # K-streamed path (auto-selected when resident M would not fit the
    # per-core VMEM budget, e.g. large D on v7x) — forced here at small D.
    out_k = jax.block_until_ready(
        sampler_step_forward(x, a, eps, fuse_steps=True,
                             force_stream_k=True, tile_k=128))
    assert jnp.allclose(out_k, ref, **tol), "stream-K fused mismatch"

    out_k_loop = jax.block_until_ready(
        sampler_step_forward(x, a, eps, fuse_steps=False,
                             force_stream_k=True, tile_k=128))
    assert jnp.allclose(out_k_loop, ref, **tol), "stream-K loop mismatch"

    print("KERNEL_OK")
</pallas_src>

<mosaic_0001>
module attributes {stable_mosaic.version = 11 : i64} {
  func.func @_resident_m_kernel(%arg0: i32, %arg1: memref<128x256xf32, #tpu.memory_space<vmem>>, %arg2: memref<256x256xbf16, #tpu.memory_space<vmem>>, %arg3: memref<128x256xf32, #tpu.memory_space<vmem>>) attributes {dimension_semantics = [#tpu.dimension_semantics<parallel>], iteration_bounds = array<i64: 4>, scalar_prefetch = 0 : i64, scratch_operands = 0 : i64, tpu.core_type = #tpu.core_type<tc>, window_params = [{transform_indices = @transform_0, window_bounds = array<i64: 128, 256>}, {pipeline_mode = #tpu.pipeline_mode<synchronous>, transform_indices = @transform_1, window_bounds = array<i64: 256, 256>}, {transform_indices = @transform_2, window_bounds = array<i64: 128, 256>}]} {
    %c0 = arith.constant 0 : index
    %c0_0 = arith.constant 0 : index
    %0 = vector.load %arg2[%c0, %c0_0] : memref<256x256xbf16, #tpu.memory_space<vmem>>, vector<256x256xbf16>
    %c0_1 = arith.constant 0 : index
    %c0_2 = arith.constant 0 : index
    %1 = vector.load %arg1[%c0_1, %c0_2] : memref<128x256xf32, #tpu.memory_space<vmem>>, vector<128x256xf32>
    %2 = arith.truncf %1 : vector<128x256xf32> to vector<128x256xbf16>
    %cst = arith.constant dense<0.000000e+00> : vector<128x256xf32>
    %3 = tpu.matmul %2, %0, %cst {dimension_numbers = #tpu.dot_dimension_numbers<[1], [0], [0], [1], [0, 0, 1, 1], [], []>} : vector<128x256xbf16>, vector<256x256xbf16>, vector<128x256xf32> -> vector<128x256xf32>
    %c0_3 = arith.constant 0 : index
    %c0_4 = arith.constant 0 : index
    %4 = vector.load %arg3[%c0_3, %c0_4] : memref<128x256xf32, #tpu.memory_space<vmem>>, vector<128x256xf32>
    tpu.vector_store %arg3[%c0_3, %c0_4], %3 {strides = array<i32>} : memref<128x256xf32, #tpu.memory_space<vmem>>, vector<128x256xf32>,
    return
  }
  func.func @transform_0(%arg0: i32) -> (i32, i32) {
    %c0_i32 = arith.constant 0 : i32
    %c0_i32_0 = arith.constant 0 : i32
    return %arg0, %c0_i32 : i32, i32
  }
  func.func @transform_1(%arg0: i32) -> (i32, i32) {
    %c0_i32 = arith.constant 0 : i32
    %c0_i32_0 = arith.constant 0 : i32
    %c0_i32_1 = arith.constant 0 : i32
    return %c0_i32, %c0_i32_0 : i32, i32
  }
  func.func @transform_2(%arg0: i32) -> (i32, i32) {
    %c0_i32 = arith.constant 0 : i32
    %c0_i32_0 = arith.constant 0 : i32
    return %arg0, %c0_i32 : i32, i32
  }
}

</mosaic_0001>

<bundles_post_ra>
// kernel: tpu_custom_call.1
= control target key start
LH: loop header
LB: loop body
LE: loop exit
PB: predicated region body
PF: predicated region fallthrough
CT: control target
= control target key end

     0   :  { %7 = vsyncpa [#allocation3], 0  ;;  %s1279_s0 = inlined_call_operand.hbm [shape: f32[512,256], index: 0, kind: input, shape index: {}]   ;;  %s1280_s1 = inlined_call_operand.hbm [shape: bf16[256,256], index: 1, kind: input, shape index: {}]   ;;  %s1281_s2 = inlined_call_operand.hbm [shape: f32[512,256], index: 2, kind: output, shape index: {}]  }
   0x1   :  { %9 = vsyncpa [#allocation3 + $0x1], 0 }
   0x2   :  { %10 = vsyncpa [#allocation6], 0 }
   0x3   :  { %11 = vsyncpa [#allocation4], 0 }
   0x4   :  { %13 = vsyncpa [#allocation4 + $0x1], 0  ;;  %s1014_s9 = smov 0   ;;  %s1016_s10 = smov 0  }
   0x5   :  { %s1018_s11 = smov 0   ;;  %s1020_s12 = smov 0  }
   0x6 LB: > { %s1035_s13 = sadd.s32 4294967295, %s988_s12   ;;  %s663_s14 = sadd.s32 4294967294, %s988_s12   ;;  %s988_s12 = sphi %s1020_s12, %s1300_s12   ;;  %s984_s11 = sphi %s1018_s11, %s1299_s11   ;;  %s980_s10 = sphi %s1016_s10, %s1298_s10   ;;  %s976_s9 = sphi %s1014_s9, %s1297_s9  }
   0x7   : > { %p39_p0 = scmp.ne.s32.totalorder %s980_s10, %s976_s9  ;;  %p1282_p1 = scmp.eq.s32.totalorder %s1035_s13, 0 }
   0x8   : > { %p90_p3 = scmp.eq.s32.totalorder %s663_s14, 3  ;;  %p664_p5 = scmp.ge.s32.totalorder %s988_s12, 1 }
   0x9   : > { %p1044_p4 = por %p1282_p1, %p39_p0  ;;  %p97_p7 = scmp.lt.s32.totalorder %s988_s12, 5 }
   0xa   : > { %p1049_p6 = por %p90_p3, %p39_p0  ;;  %s990_s18 = smov [#allocation5]  }
   0xb   : > { %s1285_s15 = scalar_select %p1044_p4, 1, 0 }
   0xc   : > { %s1286_s16 = scalar_select %p1049_p6, 1, 0 }
   0xd   : > { %p1054_p8 = pnand %p664_p5, %p97_p7  ;;  %s109_s19 = sshll.u32 %s990_s18, 4  ;;  %s110_s19 = int_to_ptr.vmem [resolvable:$true] %s109_s19 }
   0xe   : > { %s1067_s21 = sadd.s32 1, %s988_s12   ;;  %s26_s22 = sadd.s32 1, %s984_s11 }
   0xf   : > { %s1287_s17 = scalar_select %p1054_p8, 1, 0 }
  0x10   : > { %p757_p9 = pneg %p1054_p8  ;;  %s23_s23 = ssub.s32 %s988_s12, %s1067_s21 }
  0x11   : > { %s860_s26 = scalar_lea.hbm %s1280_s1, 4096 }
  0x12   : > { %p1062_p10 = pnand %p757_p9, %p1282_p1  ;;  %p861_p11 = scmp.ne.s32.totalorder %s1280_s1, %s860_s26 }
  0x13   : > { %p867_p3 = scmp.lt.u32.totalorder %s860_s26, %s1280_s1 }
  0x14   : > { %p862_p12 = pneg %p1062_p10 }
  0x16   : > { %p863_p13 = pnand %p862_p12, %p861_p11 }
  0x18   : > { %p864_p0 = pneg %p863_p13 }
  0x1a   : > { %p869_p5 = pnand %p867_p3, %p864_p0 }
  0x1c   : > { %872 = shalt.err (!%p869_p5)
}
  0x1d   : > { %s873_s3 = scalar_lea.vmem %s110_s19, 4096  ;;  %p881_p2 = scmp.lt.s32.totalorder %s110_s19, %s110_s19 }
  0x1e   : > { %p874_p7 = scmp.ne.s32.totalorder %s110_s19, %s873_s3  ;;  %p882_p6 = scmp.lt.s32.totalorder %s873_s3, %s873_s3 }
  0x20   : > { %p876_p9 = pnand %p874_p7, %p862_p12  ;;  %p883_p4 = por %p882_p6, %p881_p2 }
  0x22   : > { %p877_p1 = pneg %p876_p9 }
  0x24   : > { %p884_p8 = pnand %p883_p4, %p877_p1 }
  0x26   : > { %887 = shalt.err (!%p884_p8)
}
  0x27   : > { %s991_s4 = smov 128   ;;  %s992_s5 = smov 8  }
  0x28   : > { %760 = dma.hbm_to_vmem [thread:$0]  (!%p1062_p10), %s1280_s1, 4096, %s110_s19, [#allocation6], %s991_s4, %s991_s4, %s992_s5  }
  0x29   : > { %p24_p11 = scmp.eq.s32.totalorder %s23_s23, 0  ;;  %p33_p2 = scmp.ne.s32.totalorder %s984_s11, %s980_s10 }
  0x2a   : > { %p34_p1 = scmp.eq.s32.totalorder %s988_s12, 0  ;;  %p770_p4 = scmp.lt.s32.totalorder %s988_s12, 4 }
  0x2b   : > { %s1093_s8 = scalar_select %p24_p11, %s984_s11, %s26_s22  }
  0x2c   : > { %p35_p6 = por %p34_p1, %p33_p2  ;;  %p1289_p8 = scmp.eq.s32.totalorder %s1035_s13, 3 }
  0x2d   : > { %s123_s18 = sand.u32 1, %s984_s11   ;;  %s714_s24 = sshll.u32 %s988_s12, 12 }
  0x2e   : > { %p1097_p12 = por %p1289_p8, %p33_p2  ;;  %s667_s25 = sshll.u32 %s123_s18, 8 }
  0x2f   : > { %s1106_s27 = scalar_lea.hbm %s1279_s0, %s714_s24  ;;  %s127_s19 = scalar_lea.vmem [#allocation2], %s667_s25 }
  0x30   : > { %s135_s22 = sshll.u32 %s127_s19, 4  ;;  %p1108_p10 = pnand %p770_p4, %p35_p6  ;;  %s1112_s22 = int_to_ptr.vmem [resolvable:$true] %s135_s22 }
  0x31   : > { %s1114_s28 = scalar_lea.sflag [#allocation3], %s123_s18  ;;  %s888_s29 = scalar_lea.hbm %s1106_s27, 4096 }
  0x32   : > { %p889_p13 = scmp.ne.s32.totalorder %s1106_s27, %s888_s29  ;;  %p890_p0 = pneg %p1108_p10 }
  0x33   : > { %s893_s4 = scalar_lea.hbm %s1279_s0, 16384  ;;  %p894_p7 = scmp.lt.u32.totalorder %s1106_s27, %s1279_s0 }
  0x34   : > { %p891_p3 = pnand %p890_p0, %p889_p13  ;;  %p895_p9 = scmp.lt.u32.totalorder %s893_s4, %s888_s29 }
  0x35   : > { %p897_p2 = scmp.lt.u32.totalorder %s888_s29, %s1106_s27 }
  0x36   : > { %p892_p5 = pneg %p891_p3  ;;  %p896_p11 = por %p895_p9, %p894_p7 }
  0x38   : > { %p898_p1 = por %p897_p2, %p896_p11 }
  0x3a   : > { %p899_p4 = pnand %p898_p1, %p892_p5 }
  0x3c   : > { %902 = shalt.err (!%p899_p4)
}
  0x3d   : > { %s903_s7 = scalar_lea.vmem %s1112_s22, 4096  ;;  %s993_s18 = smov [#allocation2]  }
  0x3e   : > { %p904_p6 = scmp.ne.s32.totalorder %s1112_s22, %s903_s7  ;;  %s908_s24 = sshll.u32 %s993_s18, 4  ;;  %s909_s24 = int_to_ptr.vmem [resolvable:$false] %s908_s24 }
  0x3f   : > { %s910_s25 = scalar_lea.vmem %s909_s24, 8192  ;;  %p911_p3 = scmp.lt.s32.totalorder %s1112_s22, %s909_s24 }
  0x40   : > { %p906_p8 = pnand %p904_p6, %p890_p0  ;;  %p912_p7 = scmp.lt.s32.totalorder %s910_s25, %s903_s7 }
  0x42   : > { %p907_p13 = pneg %p906_p8  ;;  %p913_p9 = por %p912_p7, %p911_p3 }
  0x44   : > { %p914_p11 = pnand %p913_p9, %p907_p13 }
  0x46   : > { %917 = shalt.err (!%p914_p11)
}
  0x47   : > { %s994_s20 = smov 256   ;;  %s995_s26 = smov 16  }
  0x48   : > { %764 = dma.hbm_to_vmem [thread:$0]  (!%p1108_p10), %s1106_s27, 4096, %s1112_s22, %s1114_s28, %s994_s20, %s994_s20, %s995_s26  }
  0x49   : > { %p1292_p0 = scmp.ne.s32.totalorder %s1287_s17, 0 }
  0x4a   : > { %s1145_s19 = sand.u32 (!%p1292_p0), 1, %s980_s10   ;;  %p1293_p5 = scmp.ne.s32.totalorder (!%p1292_p0), %s1285_s15, 0 }
  0x4b   : > { %147 = sbr.rel (%p1292_p0) target bundleno = 405 (0x195), region = 28  ;;  %s672_s29 = sshll.u32 (!%p1292_p0), %s1145_s19, 8 }
  0x4c   : > { %s150_s30 = scalar_lea.sflag (!%p1292_p0), [#allocation3], %s1145_s19  ;;  %s1151_s3 = scalar_lea.vmem (!%p1292_p0), [#allocation2], %s672_s29 }
  0x52   : > { %963 = dma.done.wait (%p1293_p5), %s150_s30, 4096  }
  0x53   : > { %965 = vsyncadd (%p1293_p5), %s150_s30, 4294963200  ;;  %p1294_p10 = scmp.eq.s32.totalorder %s1035_s13, 0 }
  0x55   : > { %967 = dma.done.wait (%p1294_p10), [#allocation6], 4096   ;;  %p1295_p2 = pmov %p1294_p10 }
  0x56   : > { %v812_v0 = vld [vmem:[#allocation5 + $0x4] ss:$8 sps:$4 sm:$0xff]   ;;  %v814_v1 = vld [vmem:[#allocation5] ss:$8 sps:$4 sm:$0xff]   ;;  %v815_v2 = vld [vmem:[#allocation5 + $0x14] ss:$8 sps:$4 sm:$0xff]  }
  0x57   : > { %969 = vsyncadd (%p1295_p2), [#allocation6], 4294963200  ;;  %420 = vmatprep.subr.bf16.mxu0 %v812_v0  ;;  %717 = vmatprep.subr.bf16.mxu1 %v812_v0  ;;  %v817_v3 = vld [vmem:[#allocation5 + $0x10] ss:$8 sps:$4 sm:$0xff]   ;;  %v818_v4 = vld [vmem:[#allocation5 + $0x24] ss:$8 sps:$4 sm:$0xff]  }
  0x58   : > { %421 = vmatpush1.bf16.msra.mxu0 %v814_v1  ;;  %733 = vmatpush1.bf16.msra.mxu1 %v814_v1  ;;  %v820_v5 = vld [vmem:[#allocation5 + $0x20] ss:$8 sps:$4 sm:$0xff]   ;;  %v821_v6 = vld [vmem:[#allocation5 + $0x34] ss:$8 sps:$4 sm:$0xff]   ;;  %v823_v7 = vld [vmem:[#allocation5 + $0x30] ss:$8 sps:$4 sm:$0xff]  }
  0x59   : > { %422 = vmatprep.subr.bf16.mxu0 %v815_v2  ;;  %718 = vmatprep.subr.bf16.mxu1 %v815_v2  ;;  %v824_v8 = vld [vmem:[#allocation5 + $0x44] ss:$8 sps:$4 sm:$0xff]   ;;  %v826_v9 = vld [vmem:[#allocation5 + $0x40] ss:$8 sps:$4 sm:$0xff]   ;;  %v827_v10 = vld [vmem:[#allocation5 + $0x54] ss:$8 sps:$4 sm:$0xff]  }
  0x5a   : > { %v829_v11 = vld [vmem:[#allocation5 + $0x50] ss:$8 sps:$4 sm:$0xff]   ;;  %v830_v12 = vld [vmem:[#allocation5 + $0x64] ss:$8 sps:$4 sm:$0xff]   ;;  %v832_v18 = vld [vmem:[#allocation5 + $0x60] ss:$8 sps:$4 sm:$0xff]  }
  0x5b   : > { %v213_v13 = vld [vmem:[%s1151_s3 + $0x8] sm:$0xff]  ;;  %v215_v14 = vld [vmem:[%s1151_s3 + $0x18] sm:$0xff]  ;;  %v212_v38 = vld [vmem:[%s1151_s3] sm:$0xff]  ;;  %s1195_s15 = scalar_lea.vmem [#allocation7], %s672_s29  ;;  %s716_s17 = sshll.u32 %s1035_s13, 12 }
  0x5c   : > { %423 = vmatpush1.bf16.msra.mxu0 %v817_v3  ;;  %734 = vmatpush1.bf16.msra.mxu1 %v817_v3  ;;  %v245_v15 = vpack.c.bf16 %v215_v14, %v213_v13  ;;  %v229_v16 = vld [vmem:[%s1151_s3 + $0x88] sm:$0xff]  ;;  %v231_v17 = vld [vmem:[%s1151_s3 + $0x98] sm:$0xff]  ;;  %v214_v39 = vld [vmem:[%s1151_s3 + $0x10] sm:$0xff]  ;;  %s580_s27 = sshll.u32 %s1195_s15, 4  ;;  %s1228_s28 = scalar_lea.hbm %s1281_s2, %s716_s17  ;;  %s1230_s27 = int_to_ptr.vmem [resolvable:$true] %s580_s27 }
  0x5d   : > { %424 = vmatprep.subr.bf16.mxu0 %v818_v4  ;;  %719 = vmatprep.subr.bf16.mxu1 %v818_v4  ;;  %v253_v19 = vpack.c.bf16 %v231_v17, %v229_v16  ;;  %v833_v20 = vld [vmem:[#allocation5 + $0x74] ss:$8 sps:$4 sm:$0xff]   ;;  %v835_v21 = vld [vmem:[#allocation5 + $0x70] ss:$8 sps:$4 sm:$0xff]   ;;  %v836_v22 = vld [vmem:[#allocation5 + $0x84] ss:$8 sps:$4 sm:$0xff]   ;;  %v244_v46 = vpack.c.bf16 %v214_v39, %v212_v38 }
  0x5e   : > { %452 = vmatprep.mubr.bf16.mxu0 %v245_v15  ;;  %v838_v23 = vld [vmem:[#allocation5 + $0x80] ss:$8 sps:$4 sm:$0xff]   ;;  %v839_v24 = vld [vmem:[#allocation5 + $0x94] ss:$8 sps:$4 sm:$0xff]   ;;  %v841_v25 = vld [vmem:[#allocation5 + $0x90] ss:$8 sps:$4 sm:$0xff]  }
  0x5f   : > { %492 = vmatprep.mubr.bf16.mxu1 %v253_v19  ;;  %v842_v26 = vld [vmem:[#allocation5 + $0xa4] ss:$8 sps:$4 sm:$0xff]   ;;  %v844_v27 = vld [vmem:[#allocation5 + $0xa0] ss:$8 sps:$4 sm:$0xff]   ;;  %v845_v28 = vld [vmem:[#allocation5 + $0xb4] ss:$8 sps:$4 sm:$0xff]  }
  0x60   : > { %425 = vmatpush1.bf16.msra.mxu0 %v820_v5  ;;  %735 = vmatpush1.bf16.msra.mxu1 %v820_v5  ;;  %v847_v29 = vld [vmem:[#allocation5 + $0xb0] ss:$8 sps:$4 sm:$0xff]   ;;  %v848_v30 = vld [vmem:[#allocation5 + $0xc4] ss:$8 sps:$4 sm:$0xff]   ;;  %v850_v31 = vld [vmem:[#allocation5 + $0xc0] ss:$8 sps:$4 sm:$0xff]  }
  0x61   : > { %426 = vmatprep.subr.bf16.mxu0 %v821_v6  ;;  %720 = vmatprep.subr.bf16.mxu1 %v821_v6  ;;  %v851_v32 = vld [vmem:[#allocation5 + $0xd4] ss:$8 sps:$4 sm:$0xff]   ;;  %v853_v33 = vld [vmem:[#allocation5 + $0xd0] ss:$8 sps:$4 sm:$0xff]   ;;  %v854_v34 = vld [vmem:[#allocation5 + $0xe4] ss:$8 sps:$4 sm:$0xff]  }
  0x62   : > { %v856_v35 = vld [vmem:[#allocation5 + $0xe0] ss:$8 sps:$4 sm:$0xff]   ;;  %v857_v36 = vld [vmem:[#allocation5 + $0xf4] ss:$8 sps:$4 sm:$0xff]   ;;  %v859_v37 = vld [vmem:[#allocation5 + $0xf0] ss:$8 sps:$4 sm:$0xff]  }
  0x63   : > { %v228_v40 = vld [vmem:[%s1151_s3 + $0x80] sm:$0xff]  ;;  %v230_v41 = vld [vmem:[%s1151_s3 + $0x90] sm:$0xff]  ;;  %v217_v42 = vld [vmem:[%s1151_s3 + $0x28] sm:$0xff]  ;;  %s566_s13 = scalar_lea.sflag [#allocation4], %s1145_s19  ;;  %s918_s4 = scalar_lea.vmem %s1230_s27, 4096 }
  0x64   : > { %427 = vmatpush1.bf16.msra.mxu0 %v823_v7  ;;  %736 = vmatpush1.bf16.msra.mxu1 %v823_v7  ;;  %v219_v43 = vld [vmem:[%s1151_s3 + $0x38] sm:$0xff]  ;;  %v233_v44 = vld [vmem:[%s1151_s3 + $0xa8] sm:$0xff]  ;;  %v252_v47 = vpack.c.bf16 %v230_v41, %v228_v40  ;;  %v216_v50 = vld [vmem:[%s1151_s3 + $0x20] sm:$0xff]  ;;  %p919_p1 = scmp.ne.s32.totalorder %s1230_s27, %s918_s4  ;;  %s996_s5 = smov [#allocation7]  }
  0x65   : > { %428 = vmatprep.subr.bf16.mxu0 %v824_v8  ;;  %721 = vmatprep.subr.bf16.mxu1 %v824_v8  ;;  %v235_v45 = vld [vmem:[%s1151_s3 + $0xb8] sm:$0xff]  ;;  %v247_v48 = vpack.c.bf16 %v219_v43, %v217_v42  ;;  %v218_v51 = vld [vmem:[%s1151_s3 + $0x30] sm:$0xff]  ;;  %v232_v52 = vld [vmem:[%s1151_s3 + $0xa0] sm:$0xff]  ;;  %s922_s6 = sshll.u32 %s996_s5, 4  ;;  %s923_s6 = int_to_ptr.vmem [resolvable:$false] %s922_s6 }
  0x66   : > { %v255_v49 = vpack.c.bf16 %v235_v45, %v233_v44  ;;  %v234_v53 = vld [vmem:[%s1151_s3 + $0xb0] sm:$0xff]  ;;  %v221_v54 = vld [vmem:[%s1151_s3 + $0x48] sm:$0xff]  ;;  %v223_v55 = vld [vmem:[%s1151_s3 + $0x58] sm:$0xff]  ;;  %v246_v58 = vpack.c.bf16 %v218_v51, %v216_v50  ;;  %p920_p4 = pnand %p919_p1, %p1097_p12  ;;  %s924_s7 = scalar_lea.vmem %s923_s6, 8192 }
  0x67   : > { %v237_v56 = vld [vmem:[%s1151_s3 + $0xc8] sm:$0xff]  ;;  %v239_v57 = vld [vmem:[%s1151_s3 + $0xd8] sm:$0xff]  ;;  %v254_v59 = vpack.c.bf16 %v234_v53, %v232_v52  ;;  %v249_v60 = vpack.c.bf16 %v223_v55, %v221_v54  ;;  %v220_v62 = vld [vmem:[%s1151_s3 + $0x40] sm:$0xff]  ;;  %p925_p8 = scmp.lt.s32.totalorder %s1230_s27, %s923_s6  ;;  %p926_p13 = scmp.lt.s32.totalorder %s924_s7, %s918_s4 }
  0x68   : > { %429 = vmatpush1.bf16.msra.mxu0 %v826_v9  ;;  %737 = vmatpush1.bf16.msra.mxu1 %v826_v9  ;;  %v257_v61 = vpack.c.bf16 %v239_v57, %v237_v56  ;;  %v222_v63 = vld [vmem:[%s1151_s3 + $0x50] sm:$0xff]  ;;  %v236_v0 = vld [vmem:[%s1151_s3 + $0xc0] sm:$0xff]  ;;  %v225_v2 = vld [vmem:[%s1151_s3 + $0x68] sm:$0xff]  ;;  %p921_p6 = pneg %p920_p4 }
  0x69   : > { %430 = vmatprep.subr.bf16.mxu0 %v827_v10  ;;  %722 = vmatprep.subr.bf16.mxu1 %v827_v10  ;;  %v238_v1 = vld [vmem:[%s1151_s3 + $0xd0] sm:$0xff]  ;;  %v227_v3 = vld [vmem:[%s1151_s3 + $0x78] sm:$0xff]  ;;  %v241_v4 = vld [vmem:[%s1151_s3 + $0xe8] sm:$0xff]  ;;  %v248_v6 = vpack.c.bf16 %v222_v63, %v220_v62  ;;  %p927_p3 = por %p926_p13, %p925_p8 }
  0x6a   : > { %v243_v5 = vld [vmem:[%s1151_s3 + $0xf8] sm:$0xff]  ;;  %v256_v7 = vpack.c.bf16 %v238_v1, %v236_v0  ;;  %v251_v8 = vpack.c.bf16 %v227_v3, %v225_v2  ;;  %v224_v10 = vld [vmem:[%s1151_s3 + $0x60] sm:$0xff]  ;;  %v242_v13 = vld [vmem:[%s1151_s3 + $0xf0] sm:$0xff] }
  0x6b   : > { %v259_v9 = vpack.c.bf16 %v243_v5, %v241_v4  ;;  %p928_p7 = pnand %p927_p3, %p921_p6 }
  0x6c   : > { %431 = vmatpush1.bf16.msra.mxu0 %v829_v11  ;;  %738 = vmatpush1.bf16.msra.mxu1 %v829_v11  ;;  %v226_v11 = vld [vmem:[%s1151_s3 + $0x70] sm:$0xff] }
  0x6d   : > { %432 = vmatprep.subr.bf16.mxu0 %v830_v12  ;;  %723 = vmatprep.subr.bf16.mxu1 %v830_v12  ;;  %v240_v12 = vld [vmem:[%s1151_s3 + $0xe0] sm:$0xff]  ;;  %v250_v14 = vpack.c.bf16 %v226_v11, %v224_v10 }
  0x6e   : > { %v258_v15 = vpack.c.bf16 %v242_v13, %v240_v12 }
  0x70   : > { %433 = vmatpush1.bf16.msra.mxu0 %v832_v18  ;;  %739 = vmatpush1.bf16.msra.mxu1 %v832_v18 }
  0x71   : > { %434 = vmatprep.subr.bf16.mxu0 %v833_v20  ;;  %724 = vmatprep.subr.bf16.mxu1 %v833_v20 }
  0x74   : > { %435 = vmatpush1.bf16.msra.mxu0 %v835_v21  ;;  %740 = vmatpush1.bf16.msra.mxu1 %v835_v21 }
  0x75   : > { %436 = vmatprep.subr.bf16.mxu0 %v836_v22  ;;  %725 = vmatprep.subr.bf16.mxu1 %v836_v22 }
  0x78   : > { %437 = vmatpush1.bf16.msra.mxu0 %v838_v23  ;;  %741 = vmatpush1.bf16.msra.mxu1 %v838_v23 }
  0x79   : > { %438 = vmatprep.subr.bf16.mxu0 %v839_v24  ;;  %726 = vmatprep.subr.bf16.mxu1 %v839_v24 }
  0x7c   : > { %439 = vmatpush1.bf16.msra.mxu0 %v841_v25  ;;  %742 = vmatpush1.bf16.msra.mxu1 %v841_v25 }
  0x7d   : > { %440 = vmatprep.subr.bf16.mxu0 %v842_v26  ;;  %727 = vmatprep.subr.bf16.mxu1 %v842_v26 }
  0x80   : > { %441 = vmatpush1.bf16.msra.mxu0 %v844_v27  ;;  %743 = vmatpush1.bf16.msra.mxu1 %v844_v27 }
  0x81   : > { %442 = vmatprep.subr.bf16.mxu0 %v845_v28  ;;  %728 = vmatprep.subr.bf16.mxu1 %v845_v28 }
  0x84   : > { %443 = vmatpush1.bf16.msra.mxu0 %v847_v29  ;;  %744 = vmatpush1.bf16.msra.mxu1 %v847_v29 }
  0x85   : > { %444 = vmatprep.subr.bf16.mxu0 %v848_v30  ;;  %729 = vmatprep.subr.bf16.mxu1 %v848_v30 }
  0x88   : > { %445 = vmatpush1.bf16.msra.mxu0 %v850_v31  ;;  %745 = vmatpush1.bf16.msra.mxu1 %v850_v31 }
  0x89   : > { %446 = vmatprep.subr.bf16.mxu0 %v851_v32  ;;  %730 = vmatprep.subr.bf16.mxu1 %v851_v32 }
  0x8c   : > { %447 = vmatpush1.bf16.msra.mxu0 %v853_v33  ;;  %746 = vmatpush1.bf16.msra.mxu1 %v853_v33 }
  0x8d   : > { %448 = vmatprep.subr.bf16.mxu0 %v854_v34  ;;  %731 = vmatprep.subr.bf16.mxu1 %v854_v34 }
  0x90   : > { %449 = vmatpush1.bf16.msra.mxu0 %v856_v35  ;;  %747 = vmatpush1.bf16.msra.mxu1 %v856_v35 }
  0x91   : > { %450 = vmatprep.subr.bf16.mxu0 %v857_v36  ;;  %732 = vmatprep.subr.bf16.mxu1 %v857_v36 }
  0x94   : > { %451 = vmatpush1.bf16.msra.mxu0 %v859_v37  ;;  %748 = vmatpush1.bf16.msra.mxu1 %v859_v37 }
  0x97   : > { %453 = vmatmul.mubr.bf16.vlgmr.msra.gmra.mrb[0].mxu0 %v244_v46  ;;  %493 = vmatmul.mubr.bf16.vlgmr.msra.gmra.mrb[0].mxu1 %v252_v47 }
  0x98   : > { %462 = vmatprep.mubr.bf16.mxu0 %v247_v48  ;;  %502 = vmatprep.mubr.bf16.mxu1 %v255_v49 }
  0x9f   : > { %463 = vmatmul.mubr.bf16.gmra.mrb[4].mxu0 %v246_v58  ;;  %503 = vmatmul.mubr.bf16.gmra.mrb[4].mxu1 %v254_v59 }
  0xa0   : > { %472 = vmatprep.mubr.bf16.mxu0 %v249_v60  ;;  %512 = vmatprep.mubr.bf16.mxu1 %v257_v61 }
  0xa7   : > { %473 = vmatmul.mubr.bf16.gmra.mrb[8].mxu0 %v248_v6  ;;  %513 = vmatmul.mubr.bf16.gmra.mrb[8].mxu1 %v256_v7 }
  0xa8   : > { %482 = vmatprep.mubr.bf16.mxu0 %v251_v8  ;;  %522 = vmatprep.mubr.bf16.mxu1 %v259_v9 }
  0xaf   : > { %483 = vmatmul.mubr.bf16.gmra.mrb[12].mxu0 %v250_v14  ;;  %523 = vmatmul.mubr.bf16.gmra.mrb[12].mxu1 %v258_v15 }
 0x16a   : > { %v454_v16 = vpop.f32.mrb[0].mxu0  ;;  %v494_v17 = vpop.f32.mrb[0].mxu1 }
 0x16b   : > { %533 = vst [vmem:[%s1195_s15] sm:$0xff] %v454_v16  ;;  %549 = vst [vmem:[%s1195_s15 + $0x80] sm:$0xff] %v494_v17  ;;  %v456_v18 = vpop.f32.mrb[1].mxu0  ;;  %v496_v19 = vpop.f32.mrb[1].mxu1 }
 0x16c   : > { %534 = vst [vmem:[%s1195_s15 + $0x8] sm:$0xff] %v456_v18  ;;  %550 = vst [vmem:[%s1195_s15 + $0x88] sm:$0xff] %v496_v19  ;;  %v458_v20 = vpop.f32.mrb[2].mxu0  ;;  %v498_v21 = vpop.f32.mrb[2].mxu1 }
 0x16d   : > { %535 = vst [vmem:[%s1195_s15 + $0x10] sm:$0xff] %v458_v20  ;;  %551 = vst [vmem:[%s1195_s15 + $0x90] sm:$0xff] %v498_v21  ;;  %v460_v22 = vpop.f32.mrb[3].mxu0  ;;  %v500_v23 = vpop.f32.mrb[3].mxu1 }
 0x16e   : > { %536 = vst [vmem:[%s1195_s15 + $0x18] sm:$0xff] %v460_v22  ;;  %552 = vst [vmem:[%s1195_s15 + $0x98] sm:$0xff] %v500_v23 }
 0x172   : > { %v464_v24 = vpop.f32.mrb[4].mxu0  ;;  %v504_v25 = vpop.f32.mrb[4].mxu1 }
 0x173   : > { %537 = vst [vmem:[%s1195_s15 + $0x20] sm:$0xff] %v464_v24  ;;  %553 = vst [vmem:[%s1195_s15 + $0xa0] sm:$0xff] %v504_v25  ;;  %v466_v26 = vpop.f32.mrb[5].mxu0  ;;  %v506_v27 = vpop.f32.mrb[5].mxu1 }
 0x174   : > { %538 = vst [vmem:[%s1195_s15 + $0x28] sm:$0xff] %v466_v26  ;;  %554 = vst [vmem:[%s1195_s15 + $0xa8] sm:$0xff] %v506_v27  ;;  %v468_v28 = vpop.f32.mrb[6].mxu0  ;;  %v508_v29 = vpop.f32.mrb[6].mxu1 }
 0x175   : > { %539 = vst [vmem:[%s1195_s15 + $0x30] sm:$0xff] %v468_v28  ;;  %555 = vst [vmem:[%s1195_s15 + $0xb0] sm:$0xff] %v508_v29  ;;  %v470_v30 = vpop.f32.mrb[7].mxu0  ;;  %v510_v31 = vpop.f32.mrb[7].mxu1 }
 0x176   : > { %540 = vst [vmem:[%s1195_s15 + $0x38] sm:$0xff] %v470_v30  ;;  %556 = vst [vmem:[%s1195_s15 + $0xb8] sm:$0xff] %v510_v31 }
 0x17a   : > { %v474_v32 = vpop.f32.mrb[8].mxu0  ;;  %v514_v33 = vpop.f32.mrb[8].mxu1 }
 0x17b   : > { %541 = vst [vmem:[%s1195_s15 + $0x40] sm:$0xff] %v474_v32  ;;  %557 = vst [vmem:[%s1195_s15 + $0xc0] sm:$0xff] %v514_v33  ;;  %v476_v34 = vpop.f32.mrb[9].mxu0  ;;  %v516_v35 = vpop.f32.mrb[9].mxu1 }
 0x17c   : > { %542 = vst [vmem:[%s1195_s15 + $0x48] sm:$0xff] %v476_v34  ;;  %558 = vst [vmem:[%s1195_s15 + $0xc8] sm:$0xff] %v516_v35  ;;  %v478_v36 = vpop.f32.mrb[10].mxu0  ;;  %v518_v37 = vpop.f32.mrb[10].mxu1 }
 0x17d   : > { %543 = vst [vmem:[%s1195_s15 + $0x50] sm:$0xff] %v478_v36  ;;  %559 = vst [vmem:[%s1195_s15 + $0xd0] sm:$0xff] %v518_v37  ;;  %v480_v38 = vpop.f32.mrb[11].mxu0  ;;  %v520_v39 = vpop.f32.mrb[11].mxu1 }
 0x17e   : > { %544 = vst [vmem:[%s1195_s15 + $0x58] sm:$0xff] %v480_v38  ;;  %560 = vst [vmem:[%s1195_s15 + $0xd8] sm:$0xff] %v520_v39 }
 0x182   : > { %v484_v40 = vpop.f32.mrb[12].mxu0  ;;  %v524_v41 = vpop.f32.mrb[12].mxu1 }
 0x183   : > { %545 = vst [vmem:[%s1195_s15 + $0x60] sm:$0xff] %v484_v40  ;;  %561 = vst [vmem:[%s1195_s15 + $0xe0] sm:$0xff] %v524_v41  ;;  %v486_v42 = vpop.f32.mrb[13].mxu0  ;;  %v526_v43 = vpop.f32.mrb[13].mxu1 }
 0x184   : > { %546 = vst [vmem:[%s1195_s15 + $0x68] sm:$0xff] %v486_v42  ;;  %562 = vst [vmem:[%s1195_s15 + $0xe8] sm:$0xff] %v526_v43  ;;  %v488_v44 = vpop.f32.mrb[14].mxu0  ;;  %v528_v45 = vpop.f32.mrb[14].mxu1 }
 0x185   : > { %547 = vst [vmem:[%s1195_s15 + $0x70] sm:$0xff] %v488_v44  ;;  %563 = vst [vmem:[%s1195_s15 + $0xf0] sm:$0xff] %v528_v45  ;;  %v490_v46 = vpop.f32.mrb[15].mxu0  ;;  %v530_v47 = vpop.f32.mrb[15].mxu1 }
 0x186   : > { %548 = vst [vmem:[%s1195_s15 + $0x78] sm:$0xff] %v490_v46  ;;  %564 = vst [vmem:[%s1195_s15 + $0xf8] sm:$0xff] %v530_v47 }
 0x187   : > { %931 = shalt.err (!%p928_p7)
}
 0x188   : > { %s932_s18 = scalar_lea.hbm %s1228_s28, 4096  ;;  %s936_s20 = scalar_lea.hbm %s1281_s2, 16384 }
 0x189   : > { %p933_p9 = scmp.ne.s32.totalorder %s1228_s28, %s932_s18  ;;  %p937_p5 = scmp.lt.u32.totalorder %s1228_s28, %s1281_s2 }
 0x18a   : > { %p938_p10 = scmp.lt.u32.totalorder %s936_s20, %s932_s18  ;;  %p940_p1 = scmp.lt.u32.totalorder %s932_s18, %s1228_s28 }
 0x18b   : > { %p934_p11 = pnand %p933_p9, %p1097_p12 }
 0x18c   : > { %p939_p2 = por %p938_p10, %p937_p5 }
 0x18d   : > { %p935_p0 = pneg %p934_p11 }
 0x18e   : > { %p941_p4 = por %p940_p1, %p939_p2 }
 0x190   : > { %p942_p6 = pnand %p941_p4, %p935_p0 }
 0x192   : > { %945 = shalt.err (!%p942_p6)
}
 0x193   : > { %s997_s30 = smov 256   ;;  %s998_s3 = smov 16  }
 0x194   : > { %755 = dma.vmem_to_hbm [thread:$0]  (%p1097_p12), %s1230_s27, 4096, %s1228_s28, %s566_s13, %s997_s30, %s997_s30, %s998_s3  }
 0x195 PF: > { %p772_p8 = scmp.ge.s32.totalorder %s988_s12, 2  ;;  %s595_s15 = sand.u32 1, %s976_s9  }
 0x196   : > { %p1296_p13 = scmp.ne.s32.totalorder %s1286_s16, 0  ;;  %s596_s17 = scalar_lea.sflag [#allocation4], %s595_s15 }
 0x198   : > { %p766_p3 = pnand %p772_p8, %p1296_p13 }
 0x19a   : > { %971 = dma.done.wait (!%p766_p3), %s596_s17, 4096  }
 0x19b   : > { %973 = vsyncadd (!%p766_p3), %s596_s17, 4294963200  ;;  %p16_p7 = scmp.ge.s32.totalorder %s1067_s21, 6   ;;  %s1297_s9 = smov %s980_s10 }
 0x19c   : > { %s1298_s10 = smov %s984_s11  ;;  %s1299_s11 = smov %s1093_s8 }
 0x19d   : > { %s1300_s12 = smov %s1067_s21  ;;  %18 = sbr.rel (!%p16_p7) target bundleno = 6 (0x6), region = 77 }
 0x1a4   :  { %601 = vsyncpa [#allocation3], 1 }
 0x1a5   :  { %603 = vsyncpa [#allocation3 + $0x1], 1 }
 0x1a6   :  { %604 = vsyncpa [#allocation6], 1 }
 0x1a7   :  { %605 = vsyncpa [#allocation4], 1 }
 0x1a8   :  { %607 = vsyncpa [#allocation4 + $0x1], 1 }

</bundles_post_ra>
